<compile_context>
chip_gen: v7x
topology: tpu7x:2x2x1
jax: 0.10.0
libtpu: 0.0.40
codegen_flags: <defaults>
</compile_context>

<pallas_src>
import functools

import jax
import jax.numpy as jnp
from jax.experimental import pallas as pl
from jax.experimental.pallas import tpu as pltpu


def _round_up(x, m):
    return ((x + m - 1) // m) * m


def _magnn_attn_intra_kernel(dst_ref, h_ref, attn_ref, out_ref,
                             acc_ref, den_ref, m_ref,
                             *, negative_slope, tile_n):
    j = pl.program_id(1)

    @pl.when(j == 0)
    def _init():
        acc_ref[...] = jnp.zeros_like(acc_ref)
        den_ref[...] = jnp.zeros_like(den_ref)
        m_ref[...] = jnp.full_like(m_ref, -1e30)

    h = h_ref[...].astype(jnp.float32)                      # [tE, HDp]

    # Per-edge score replicated across each head's D lanes via one MXU matmul
    # against a block-structured attn matrix -> lane-dense [tE, HDp].
    # bf16 operands, f32 accumulation.
    score = jnp.dot(h.astype(jnp.bfloat16), attn_ref[...],
                    preferred_element_type=jnp.float32)
    score = jnp.where(score >= 0, score, negative_slope * score)   # leaky_relu

    # Online running max (per head-lane, shared across the node tile) -- a
    # valid softmax shift (same shift in numerator and denominator); removes
    # the [N,H,E] masked segment-max entirely.
    m_prev = m_ref[...]                                     # [1, HDp]
    m_new = jnp.maximum(m_prev, jnp.max(score, axis=0, keepdims=True))
    alpha = jnp.exp(m_prev - m_new)                         # rescale factor
    p = jnp.exp(score - m_new)                              # [tE, HDp]

    # One-hot incidence for this (node tile, edge tile). Padded edges carry
    # dst = -1, so they never match a node row (no phantom contributions).
    dst = dst_ref[...]                                      # [1, tE] int32
    base = pl.program_id(0) * tile_n
    node_ids = base + jax.lax.broadcasted_iota(
        jnp.int32, (tile_n, dst.shape[1]), 0)               # [tN, tE]
    onehot = (node_ids == dst).astype(jnp.float32).astype(jnp.bfloat16)

    weighted = (p * h).astype(jnp.bfloat16)                 # [tE, HDp]
    p_b = p.astype(jnp.bfloat16)

    # bf16 MXU operands, f32 accumulation.
    acc_ref[...] = alpha * acc_ref[...] + jnp.dot(
        onehot, weighted, preferred_element_type=jnp.float32)
    den_ref[...] = alpha * den_ref[...] + jnp.dot(
        onehot, p_b, preferred_element_type=jnp.float32)
    m_ref[...] = m_new

    @pl.when(j == pl.num_programs(1) - 1)
    def _finalize():
        # Nodes with no incoming edges keep acc == 0 -> output 0 (= elu(0)).
        den = jnp.maximum(den_ref[...], 1e-30)
        ratio = acc_ref[...] * pl.reciprocal(den, approx=True)
        # ELU (alpha=1). exp(x)-1 instead of expm1 for guaranteed Mosaic
        # lowering; cancellation error (~1e-7) is far below bf16 matmul noise.
        out_ref[...] = jnp.where(ratio > 0, ratio, jnp.exp(ratio) - 1.0)


def magnn_attn_intra(h_meta, attn_r, dst_idx, num_dst, *,
                     negative_slope=0.01, tile_n=128, tile_e=512):
    """h_meta: [E, H, D], attn_r: [H, D], dst_idx: [E] int -> [num_dst, H*D]."""
    E, H, D = h_meta.shape
    HD = H * D
    HD_pad = _round_up(HD, 128)                    # lane-dense output/intermediates

    tile_e = min(tile_e, _round_up(E, 128))
    E_pad = _round_up(E, tile_e)
    tile_n = min(tile_n, _round_up(num_dst, 8))
    N_pad = _round_up(num_dst, tile_n)

    # Lane-dense, padded edge features [E_pad, HD_pad] (kept in input dtype;
    # no forced f32 DMA -- upcast happens inside the kernel where needed).
    h_flat = jnp.zeros((E_pad, HD_pad), h_meta.dtype).at[:E, :HD].set(
        h_meta.reshape(E, HD))

    # Padded dst indices; sentinel -1 marks padded edges.
    dst = jnp.full((1, E_pad), -1, jnp.int32).at[0, :E].set(
        dst_idx.astype(jnp.int32))

    # Block-structured attention matrix so that (h_flat @ attn_mat)[e, h*D+d]
    # == sum_d' h[e,h,d'] * attn_r[h,d']  (score replicated across each head's
    # D lanes -> no skinny H-wide intermediates, no lane expansion later).
    # Stored bf16: MXU operand + halves its DMA / VMEM footprint.
    idx = jnp.arange(HD)
    same_head = (idx[:, None] // D) == (idx[None, :] // D)
    attn_small = jnp.where(
        same_head, attn_r.reshape(HD).astype(jnp.float32)[:, None], 0.0)
    attn_mat = jnp.zeros((HD_pad, HD_pad), jnp.float32).at[:HD, :HD].set(
        attn_small).astype(jnp.bfloat16)

    grid = (N_pad // tile_n, E_pad // tile_e)
    n_node_tiles = grid[0]

    kernel = functools.partial(_magnn_attn_intra_kernel,
                               negative_slope=negative_slope, tile_n=tile_n)

    cost = pl.CostEstimate(
        flops=int((2 * E_pad * HD_pad * HD_pad            # score matmul
                   + 4 * tile_n * E_pad * HD_pad)         # two aggregation matmuls
                  * n_node_tiles),
        transcendentals=int(2 * E_pad * HD_pad * n_node_tiles),
        bytes_accessed=int(E_pad * HD_pad * jnp.dtype(h_flat.dtype).itemsize
                           * n_node_tiles
                           + N_pad * HD_pad * 4 + E_pad * 4),
    )

    out = pl.pallas_call(
        kernel,
        out_shape=jax.ShapeDtypeStruct((N_pad, HD_pad), jnp.float32),
        grid_spec=pltpu.PrefetchScalarGridSpec(
            num_scalar_prefetch=0,
            grid=grid,
            in_specs=[
                pl.BlockSpec((1, tile_e), lambda i, j: (0, j)),        # dst ids
                pl.BlockSpec((tile_e, HD_pad), lambda i, j: (j, 0)),   # h (edge tile)
                pl.BlockSpec((HD_pad, HD_pad), lambda i, j: (0, 0)),   # attn matrix
            ],
            out_specs=pl.BlockSpec((tile_n, HD_pad), lambda i, j: (i, 0)),
            scratch_shapes=[
                pltpu.VMEM((tile_n, HD_pad), jnp.float32),   # acc (weighted sum)
                pltpu.VMEM((tile_n, HD_pad), jnp.float32),   # denom (lane-broadcast)
                pltpu.VMEM((1, HD_pad), jnp.float32),        # running max
            ]),
        compiler_params=pltpu.CompilerParams(
            dimension_semantics=("parallel", "arbitrary"),
            vmem_limit_bytes=32 * 1024 * 1024),
        cost_estimate=cost,
    )(dst, h_flat, attn_mat)

    return out[:num_dst, :HD]


def _reference(h, ar, dst, N, negative_slope=0.01):
    """Pure-JAX reference of the same forward pass (segment softmax + sum)."""
    score = jnp.sum(h * ar[None], axis=-1)
    score = jnp.where(score >= 0, score, negative_slope * score)
    m = jax.ops.segment_max(score, dst, num_segments=N)
    m = jnp.where(jnp.isfinite(m), m, 0.0)
    p = jnp.exp(score - m[dst])
    denom = jax.ops.segment_sum(p, dst, num_segments=N)
    a = p / denom[dst]
    out = jax.ops.segment_sum(a[:, :, None] * h, dst, num_segments=N)
    out = jnp.where(out > 0, out, jnp.expm1(out))
    return out.reshape(N, -1)


if __name__ == "__main__":
    key = jax.random.PRNGKey(0)
    num_heads, out_feats = 4, 8
    in_feats = num_heads * out_feats          # module views feat[0] as (-1, H, D)
    E, N = 16, 8                              # metapath instances, destination nodes

    k1, k2, k3 = jax.random.split(key, 3)
    # feat[0]: metapath-instance features; feat[1] only contributes its shape[0] (= N)
    feat0 = jax.random.normal(k1, (E, in_feats), dtype=jnp.float32)
    metapath_idx = jax.random.randint(k2, (E, 3), 0, N)   # column 0 = dst node id

    # attn_r parameter: xavier_normal_(gain=1.414) on shape (1, H, D)
    fan_in, fan_out = num_heads * out_feats, out_feats
    std = 1.414 * (2.0 / (fan_in + fan_out)) ** 0.5
    attn_r = std * jax.random.normal(k3, (1, num_heads, out_feats), dtype=jnp.float32)

    # feat_drop / attn_drop are identity in eval mode.
    h_meta = feat0.reshape(E, num_heads, out_feats)
    dst_idx = metapath_idx[:, 0]

    out = magnn_attn_intra(h_meta, attn_r[0], dst_idx, N)
    out = jax.block_until_ready(out)

    ref = _reference(h_meta, attn_r[0], dst_idx, N)
    assert out.shape == (N, num_heads * out_feats)
    err = float(jnp.max(jnp.abs(out - ref)))
    # Tolerance covers bf16 MXU operands (f32 accumulation) throughout.
    assert jnp.allclose(out, ref, rtol=2e-2, atol=2e-2), err
    print("KERNEL_OK")
</pallas_src>

<mosaic_0001>
module attributes {stable_mosaic.version = 11 : i64} {
  func.func @_magnn_attn_intra_kernel(%arg0: i32, %arg1: i32, %arg2: memref<1x128xi32, #tpu.memory_space<vmem>>, %arg3: memref<128x128xf32, #tpu.memory_space<vmem>>, %arg4: memref<128x128xbf16, #tpu.memory_space<vmem>>, %arg5: memref<8x128xf32, #tpu.memory_space<vmem>>, %arg6: memref<8x128xf32, #tpu.memory_space<vmem>>, %arg7: memref<8x128xf32, #tpu.memory_space<vmem>>, %arg8: memref<1x128xf32, #tpu.memory_space<vmem>>) attributes {dimension_semantics = [#tpu.dimension_semantics<parallel>, #tpu.dimension_semantics<arbitrary>], iteration_bounds = array<i64: 1, 1>, scalar_prefetch = 0 : i64, scratch_operands = 3 : i64, tpu.core_type = #tpu.core_type<tc>, window_params = [{transform_indices = @transform_0, window_bounds = array<i64: 1, 128>}, {transform_indices = @transform_1, window_bounds = array<i64: 128, 128>}, {pipeline_mode = #tpu.pipeline_mode<synchronous>, transform_indices = @transform_2, window_bounds = array<i64: 128, 128>}, {transform_indices = @transform_3, window_bounds = array<i64: 8, 128>}]} {
    %c0_i32 = arith.constant 0 : i32
    %0 = arith.cmpi eq, %arg1, %c0_i32 : i32
    %1 = arith.extui %0 : i1 to i32
    %c0_i32_0 = arith.constant 0 : i32
    %2 = arith.cmpi ne, %1, %c0_i32_0 : i32
    scf.if %2 {
      %cst_25 = arith.constant 0.000000e+00 : f32
      %50 = vector.broadcast %cst_25 : f32 to vector<8x128xf32>
      %c0_26 = arith.constant 0 : index
      %c0_27 = arith.constant 0 : index
      %51 = vector.load %arg6[%c0_26, %c0_27] : memref<8x128xf32, #tpu.memory_space<vmem>>, vector<8x128xf32>
      tpu.vector_store %arg6[%c0_26, %c0_27], %50 {strides = array<i32>} : memref<8x128xf32, #tpu.memory_space<vmem>>, vector<8x128xf32>,
      %cst_28 = arith.constant 0.000000e+00 : f32
      %52 = vector.broadcast %cst_28 : f32 to vector<8x128xf32>
      %c0_29 = arith.constant 0 : index
      %c0_30 = arith.constant 0 : index
      %53 = vector.load %arg7[%c0_29, %c0_30] : memref<8x128xf32, #tpu.memory_space<vmem>>, vector<8x128xf32>
      tpu.vector_store %arg7[%c0_29, %c0_30], %52 {strides = array<i32>} : memref<8x128xf32, #tpu.memory_space<vmem>>, vector<8x128xf32>,
      %cst_31 = arith.constant -1.000000e+30 : f32
      %54 = vector.broadcast %cst_31 : f32 to vector<1x128xf32>
      %c0_32 = arith.constant 0 : index
      %c0_33 = arith.constant 0 : index
      %55 = vector.load %arg8[%c0_32, %c0_33] : memref<1x128xf32, #tpu.memory_space<vmem>>, vector<1x128xf32>
      tpu.vector_store %arg8[%c0_32, %c0_33], %54 {strides = array<i32>} : memref<1x128xf32, #tpu.memory_space<vmem>>, vector<1x128xf32>,
    } else {
    }
    %c0 = arith.constant 0 : index
    %c0_1 = arith.constant 0 : index
    %3 = vector.load %arg3[%c0, %c0_1] : memref<128x128xf32, #tpu.memory_space<vmem>>, vector<128x128xf32>
    %4 = arith.truncf %3 : vector<128x128xf32> to vector<128x128xbf16>
    %c0_2 = arith.constant 0 : index
    %c0_3 = arith.constant 0 : index
    %5 = vector.load %arg4[%c0_2, %c0_3] : memref<128x128xbf16, #tpu.memory_space<vmem>>, vector<128x128xbf16>
    %cst = arith.constant dense<0.000000e+00> : vector<128x128xf32>
    %6 = tpu.matmul %4, %5, %cst {dimension_numbers = #tpu.dot_dimension_numbers<[1], [0], [0], [1], [0, 0, 1, 1], [], []>} : vector<128x128xbf16>, vector<128x128xbf16>, vector<128x128xf32> -> vector<128x128xf32>
    %cst_4 = arith.constant 0.000000e+00 : f32
    %7 = vector.broadcast %cst_4 : f32 to vector<128x128xf32>
    %8 = arith.cmpf oge, %6, %7 : vector<128x128xf32>
    %cst_5 = arith.constant 0.00999999977 : f32
    %9 = vector.broadcast %cst_5 : f32 to vector<128x128xf32>
    %10 = arith.mulf %9, %6 : vector<128x128xf32>
    %11 = arith.select %8, %6, %10 : vector<128x128xi1>, vector<128x128xf32>
    %c0_6 = arith.constant 0 : index
    %c0_7 = arith.constant 0 : index
    %12 = vector.load %arg8[%c0_6, %c0_7] : memref<1x128xf32, #tpu.memory_space<vmem>>, vector<1x128xf32>
    %cst_8 = arith.constant dense<0xFF800000> : vector<128xf32>
    %13 = vector.multi_reduction <maximumf>, %11, %cst_8 [0] : vector<128x128xf32> to vector<128xf32>
    %14 = vector.shape_cast %13 : vector<128xf32> to vector<1x128xf32>
    %15 = arith.maximumf %12, %14 : vector<1x128xf32>
    %16 = arith.subf %12, %15 : vector<1x128xf32>
    %17 = math.exp %16 : vector<1x128xf32>
    %18 = vector.broadcast %15 : vector<1x128xf32> to vector<128x128xf32>
    %19 = arith.subf %11, %18 : vector<128x128xf32>
    %20 = math.exp %19 : vector<128x128xf32>
    %c0_9 = arith.constant 0 : index
    %c0_10 = arith.constant 0 : index
    %21 = vector.load %arg2[%c0_9, %c0_10] : memref<1x128xi32, #tpu.memory_space<vmem>>, vector<1x128xi32>
    %c8_i32 = arith.constant 8 : i32
    %22 = arith.muli %arg0, %c8_i32 : i32
    %23 = tpu.iota {dimensions = array<i32: 0>} : vector<8x128xi32>
    %24 = vector.broadcast %22 : i32 to vector<8x128xi32>
    %25 = arith.addi %24, %23 : vector<8x128xi32>
    %26 = vector.broadcast %21 : vector<1x128xi32> to vector<8x128xi32>
    %27 = arith.cmpi eq, %25, %26 : vector<8x128xi32>
    %28 = arith.extui %27 : vector<8x128xi1> to vector<8x128xi32>
    %29 = arith.sitofp %28 : vector<8x128xi32> to vector<8x128xf32>
    %30 = arith.truncf %29 : vector<8x128xf32> to vector<8x128xbf16>
    %31 = arith.mulf %20, %3 : vector<128x128xf32>
    %32 = arith.truncf %31 : vector<128x128xf32> to vector<128x128xbf16>
    %33 = arith.truncf %20 : vector<128x128xf32> to vector<128x128xbf16>
    %c0_11 = arith.constant 0 : index
    %c0_12 = arith.constant 0 : index
    %34 = vector.load %arg6[%c0_11, %c0_12] : memref<8x128xf32, #tpu.memory_space<vmem>>, vector<8x128xf32>
    %35 = vector.broadcast %17 : vector<1x128xf32> to vector<8x128xf32>
    %36 = arith.mulf %35, %34 : vector<8x128xf32>
    %cst_13 = arith.constant dense<0.000000e+00> : vector<8x128xf32>
    %37 = tpu.matmul %30, %32, %cst_13 {dimension_numbers = #tpu.dot_dimension_numbers<[1], [0], [0], [1], [0, 0, 1, 1], [], []>} : vector<8x128xbf16>, vector<128x128xbf16>, vector<8x128xf32> -> vector<8x128xf32>
    %38 = arith.addf %36, %37 : vector<8x128xf32>
    %c0_14 = arith.constant 0 : index
    %c0_15 = arith.constant 0 : index
    %39 = vector.load %arg6[%c0_14, %c0_15] : memref<8x128xf32, #tpu.memory_space<vmem>>, vector<8x128xf32>
    tpu.vector_store %arg6[%c0_14, %c0_15], %38 {strides = array<i32>} : memref<8x128xf32, #tpu.memory_space<vmem>>, vector<8x128xf32>,
    %c0_16 = arith.constant 0 : index
    %c0_17 = arith.constant 0 : index
    %40 = vector.load %arg7[%c0_16, %c0_17] : memref<8x128xf32, #tpu.memory_space<vmem>>, vector<8x128xf32>
    %41 = vector.broadcast %17 : vector<1x128xf32> to vector<8x128xf32>
    %42 = arith.mulf %41, %40 : vector<8x128xf32>
    %cst_18 = arith.constant dense<0.000000e+00> : vector<8x128xf32>
    %43 = tpu.matmul %30, %33, %cst_18 {dimension_numbers = #tpu.dot_dimension_numbers<[1], [0], [0], [1], [0, 0, 1, 1], [], []>} : vector<8x128xbf16>, vector<128x128xbf16>, vector<8x128xf32> -> vector<8x128xf32>
    %44 = arith.addf %42, %43 : vector<8x128xf32>
    %c0_19 = arith.constant 0 : index
    %c0_20 = arith.constant 0 : index
    %45 = vector.load %arg7[%c0_19, %c0_20] : memref<8x128xf32, #tpu.memory_space<vmem>>, vector<8x128xf32>
    tpu.vector_store %arg7[%c0_19, %c0_20], %44 {strides = array<i32>} : memref<8x128xf32, #tpu.memory_space<vmem>>, vector<8x128xf32>,
    %c0_21 = arith.constant 0 : index
    %c0_22 = arith.constant 0 : index
    %46 = vector.load %arg8[%c0_21, %c0_22] : memref<1x128xf32, #tpu.memory_space<vmem>>, vector<1x128xf32>
    tpu.vector_store %arg8[%c0_21, %c0_22], %15 {strides = array<i32>} : memref<1x128xf32, #tpu.memory_space<vmem>>, vector<1x128xf32>,
    %c0_i32_23 = arith.constant 0 : i32
    %47 = arith.cmpi eq, %arg1, %c0_i32_23 : i32
    %48 = arith.extui %47 : i1 to i32
    %c0_i32_24 = arith.constant 0 : i32
    %49 = arith.cmpi ne, %48, %c0_i32_24 : i32
    scf.if %49 {
      %c0_25 = arith.constant 0 : index
      %c0_26 = arith.constant 0 : index
      %50 = vector.load %arg7[%c0_25, %c0_26] : memref<8x128xf32, #tpu.memory_space<vmem>>, vector<8x128xf32>
      %cst_27 = arith.constant 1.000000e-30 : f32
      %51 = vector.broadcast %cst_27 : f32 to vector<8x128xf32>
      %52 = arith.maximumf %50, %51 : vector<8x128xf32>
      %c0_28 = arith.constant 0 : index
      %c0_29 = arith.constant 0 : index
      %53 = vector.load %arg6[%c0_28, %c0_29] : memref<8x128xf32, #tpu.memory_space<vmem>>, vector<8x128xf32>
      %54 = tpu.reciprocal %52 {approx = true} : vector<8x128xf32> -> vector<8x128xf32>
      %55 = arith.mulf %53, %54 : vector<8x128xf32>
      %cst_30 = arith.constant 0.000000e+00 : f32
      %56 = vector.broadcast %cst_30 : f32 to vector<8x128xf32>
      %57 = arith.cmpf ogt, %55, %56 : vector<8x128xf32>
      %58 = math.exp %55 : vector<8x128xf32>
      %cst_31 = arith.constant 1.000000e+00 : f32
      %59 = vector.broadcast %cst_31 : f32 to vector<8x128xf32>
      %60 = arith.subf %58, %59 : vector<8x128xf32>
      %61 = arith.select %57, %55, %60 : vector<8x128xi1>, vector<8x128xf32>
      %c0_32 = arith.constant 0 : index
      %c0_33 = arith.constant 0 : index
      %62 = vector.load %arg5[%c0_32, %c0_33] : memref<8x128xf32, #tpu.memory_space<vmem>>, vector<8x128xf32>
      tpu.vector_store %arg5[%c0_32, %c0_33], %61 {strides = array<i32>} : memref<8x128xf32, #tpu.memory_space<vmem>>, vector<8x128xf32>,
    } else {
    }
    return
  }
  func.func @transform_0(%arg0: i32, %arg1: i32) -> (i32, i32) {
    %c0_i32 = arith.constant 0 : i32
    %c0_i32_0 = arith.constant 0 : i32
    return %c0_i32, %arg1 : i32, i32
  }
  func.func @transform_1(%arg0: i32, %arg1: i32) -> (i32, i32) {
    %c0_i32 = arith.constant 0 : i32
    %c0_i32_0 = arith.constant 0 : i32
    return %arg1, %c0_i32 : i32, i32
  }
  func.func @transform_2(%arg0: i32, %arg1: i32) -> (i32, i32) {
    %c0_i32 = arith.constant 0 : i32
    %c0_i32_0 = arith.constant 0 : i32
    %c0_i32_1 = arith.constant 0 : i32
    return %c0_i32, %c0_i32_0 : i32, i32
  }
  func.func @transform_3(%arg0: i32, %arg1: i32) -> (i32, i32) {
    %c0_i32 = arith.constant 0 : i32
    %c0_i32_0 = arith.constant 0 : i32
    return %arg0, %c0_i32 : i32, i32
  }
}

</mosaic_0001>

<bundles_post_ra>
// kernel: tpu_custom_call.1
= control target key start
LH: loop header
LB: loop body
LE: loop exit
PB: predicated region body
PF: predicated region fallthrough
CT: control target
= control target key end

     0   :  { %8 = vsyncpa [#allocation6], 0  ;;  %s1054_s0 = inlined_call_operand.hbm [shape: s32[1,128], index: 0, kind: input, shape index: {}]   ;;  %s1055_s1 = inlined_call_operand.hbm [shape: f32[128,128], index: 1, kind: input, shape index: {}]   ;;  %s1056_s2 = inlined_call_operand.hbm [shape: bf16[128,128], index: 2, kind: input, shape index: {}]   ;;  %s1057_s3 = inlined_call_operand.hbm [shape: f32[8,128], index: 3, kind: output, shape index: {}]  }
   0x1   :  { %9 = vsyncpa [#allocation9], 0 }
   0x2   :  { %10 = vsyncpa [#allocation7], 0  ;;  %s819_s12 = smov [#allocation8]   ;;  %s725_s16 = scalar_lea.hbm %s1055_s1, 2048 }
   0x3   :  { %s26_s13 = sshll.u32 %s819_s12, 4  ;;  %p726_p0 = scmp.ne.s32.totalorder %s1055_s1, %s725_s16  ;;  %s27_s13 = int_to_ptr.vmem [resolvable:$true] %s26_s13 }
   0x4   :  { %p729_p1 = scmp.lt.u32.totalorder %s725_s16, %s1055_s1 }
   0x6   :  { %p731_p2 = pnand %p729_p1, %p726_p0 }
   0x8   :  { %734 = shalt.err (!%p731_p2)
}
   0x9   :  { %s735_s21 = scalar_lea.vmem %s27_s13, 2048  ;;  %p740_p4 = scmp.lt.s32.totalorder %s27_s13, %s27_s13 }
   0xa   :  { %p736_p3 = scmp.ne.s32.totalorder %s27_s13, %s735_s21  ;;  %p741_p5 = scmp.lt.s32.totalorder %s735_s21, %s735_s21 }
   0xc   :  { %p742_p6 = por %p741_p5, %p740_p4 }
   0xe   :  { %p743_p7 = pnand %p742_p6, %p736_p3 }
  0x10   :  { %746 = shalt.err (!%p743_p7)
}
  0x11   :  { %s820_s22 = smov 128   ;;  %s821_s23 = smov 8  }
  0x12   :  { %32 = dma.hbm_to_vmem [thread:$0]  %s1055_s1, 2048, %s27_s13, [#allocation9], %s820_s22, %s820_s22, %s821_s23  }
  0x13   :  { %s822_s26 = smov [#allocation5]   ;;  %s823_s28 = smov [#allocation10]  }
  0x14   :  { %s17_s27 = sshll.u32 %s822_s26, 4  ;;  %s38_s29 = sshll.u32 %s823_s28, 4  ;;  %s18_s27 = int_to_ptr.vmem [resolvable:$true] %s17_s27  ;;  %s39_s29 = int_to_ptr.vmem [resolvable:$true] %s38_s29 }
  0x15   :  { %s747_s5 = scalar_lea.hbm %s1054_s0, 16 }
  0x16   :  { %p748_p8 = scmp.ne.s32.totalorder %s1054_s0, %s747_s5  ;;  %p751_p9 = scmp.lt.u32.totalorder %s747_s5, %s1054_s0 }
  0x18   :  { %p753_p10 = pnand %p751_p9, %p748_p8 }
  0x1a   :  { %756 = shalt.err (!%p753_p10)
}
  0x1b   :  { %s757_s1 = scalar_lea.vmem %s18_s27, 16  ;;  %s761_s10 = scalar_lea.vmem %s18_s27, 32 }
  0x1c   :  { %p758_p11 = scmp.ne.s32.totalorder %s18_s27, %s757_s1  ;;  %p762_p12 = scmp.lt.s32.totalorder %s18_s27, %s18_s27 }
  0x1d   :  { %p763_p13 = scmp.lt.s32.totalorder %s761_s10, %s757_s1 }
  0x1f   :  { %p764_p0 = por %p763_p13, %p762_p12 }
  0x21   :  { %p765_p1 = pnand %p764_p0, %p758_p11 }
  0x23   :  { %768 = shalt.err (!%p765_p1)
}
  0x24   :  { %20 = dma.hbm_to_vmem [thread:$0]  %s1054_s0, 16, %s18_s27, [#allocation6]  }
  0x25   :  { %s769_s15 = scalar_lea.hbm %s1056_s2, 1024 }
  0x26   :  { %p770_p2 = scmp.ne.s32.totalorder %s1056_s2, %s769_s15  ;;  %p773_p3 = scmp.lt.u32.totalorder %s769_s15, %s1056_s2 }
  0x28   :  { %p775_p4 = pnand %p773_p3, %p770_p2 }
  0x2a   :  { %778 = shalt.err (!%p775_p4)
}
  0x2b   :  { %s779_s20 = scalar_lea.vmem %s39_s29, 1024  ;;  %p784_p6 = scmp.lt.s32.totalorder %s39_s29, %s39_s29 }
  0x2c   :  { %p780_p5 = scmp.ne.s32.totalorder %s39_s29, %s779_s20  ;;  %p785_p7 = scmp.lt.s32.totalorder %s779_s20, %s779_s20 }
  0x2e   :  { %p786_p8 = por %p785_p7, %p784_p6 }
  0x30   :  { %p787_p9 = pnand %p786_p8, %p780_p5 }
  0x32   :  { %790 = shalt.err (!%p787_p9)
}
  0x33   :  { %s824_s0 = smov 64   ;;  %s825_s21 = smov 4  }
  0x34   :  { %44 = dma.hbm_to_vmem [thread:$0]  %s1056_s2, 1024, %s39_s29, [#allocation9], %s824_s0, %s824_s0, %s825_s21  }
  0x35   :  { %813 = dma.done.wait [#allocation6], 16  }
  0x36   :  { %814 = vsyncadd [#allocation6], 4294967280 }
  0x37   :  { %815 = dma.done.wait [#allocation9], 3072  }
  0x38   :  { %816 = vsyncadd [#allocation9], 4294964224  ;;  %v679_v0 = vld [vmem:[#allocation10] sm:$0xff]   ;;  %v680_v1 = vld [vmem:[#allocation10 + $0x8] sm:$0xff]   ;;  %v826_v32 = vmov -1e+30  }
  0x39   :  { %595 = vmatprep.subr.bf16.mxu0 %v679_v0  ;;  %v681_v2 = vld [vmem:[#allocation10 + $0x10] sm:$0xff]   ;;  %v682_v3 = vld [vmem:[#allocation10 + $0x18] sm:$0xff]   ;;  %v887_v4 = vld [vmem:[#allocation8] sm:$0xff]  ;;  %61 = vst [vmem:[#allocation4] sm:$0x1] %v826_v32  ;;  %v827_v33 = vmov 0.0  }
  0x3a   :  { %596 = vmatpush3.bf16.msra.mxu0 %v679_v0  ;;  %v889_v5 = vld [vmem:[#allocation8 + $0x8] sm:$0xff]  ;;  %v683_v7 = vld [vmem:[#allocation10 + $0x20] sm:$0xff]   ;;  %v685_v9 = vld [vmem:[#allocation10 + $0x30] sm:$0xff]   ;;  %627 = vmatprep.subr.bf16.mxu1 %v827_v33  ;;  %vm828_vm0 = vmmov 0   ;;  %s830_s2 = smov [#allocation11]  }
  0x3b   :  { %597 = vmatprep.subr.bf16.mxu0 %v680_v1  ;;  %v78_v6 = vpack.c.bf16 %v889_v5, %v887_v4  ;;  %v684_v8 = vld [vmem:[#allocation10 + $0x28] sm:$0xff]   ;;  %v686_v10 = vld [vmem:[#allocation10 + $0x38] sm:$0xff]   ;;  %v893_v11 = vld [vmem:[#allocation8 + $0x10] sm:$0xff]  ;;  %643 = vmatprep.mubr.msk.bf16.mxu1 %vm828_vm0, %v827_v33  ;;  %s536_s24 = sshll.u32 %s830_s2, 4  ;;  %s537_s24 = int_to_ptr.vmem [resolvable:$true] %s536_s24 }
  0x3c   :  { %v895_v12 = vld [vmem:[#allocation8 + $0x18] sm:$0xff]  ;;  %v897_v13 = vld [vmem:[#allocation8 + $0x20] sm:$0xff]  ;;  %v899_v14 = vld [vmem:[#allocation8 + $0x28] sm:$0xff]  ;;  %s791_s25 = scalar_lea.vmem %s537_s24, 128  ;;  %p796_p11 = scmp.lt.s32.totalorder %s537_s24, %s537_s24 }
  0x3d   :  { %611 = vmatprep.mubr.bf16.mxu0 %v78_v6  ;;  %v79_v15 = vpack.c.bf16 %v895_v12, %v893_v11  ;;  %v80_v16 = vpack.c.bf16 %v899_v14, %v897_v13  ;;  %v905_v17 = vld [vmem:[#allocation8 + $0x30] sm:$0xff]  ;;  %v907_v18 = vld [vmem:[#allocation8 + $0x38] sm:$0xff]  ;;  %v909_v19 = vld [vmem:[#allocation8 + $0x40] sm:$0xff]  ;;  %p792_p10 = scmp.ne.s32.totalorder %s537_s24, %s791_s25  ;;  %p797_p12 = scmp.lt.s32.totalorder %s791_s25, %s791_s25 }
  0x3e   :  { %598 = vmatpush3.bf16.msra.mxu0 %v680_v1  ;;  %v911_v20 = vld [vmem:[#allocation8 + $0x48] sm:$0xff]  ;;  %v81_v21 = vpack.c.bf16 %v907_v18, %v905_v17  ;;  %v917_v23 = vld [vmem:[#allocation8 + $0x50] sm:$0xff]  ;;  %v919_v24 = vld [vmem:[#allocation8 + $0x58] sm:$0xff] }
  0x3f   :  { %599 = vmatprep.subr.bf16.mxu0 %v681_v2  ;;  %v82_v22 = vpack.c.bf16 %v911_v20, %v909_v19  ;;  %v921_v25 = vld [vmem:[#allocation8 + $0x60] sm:$0xff]  ;;  %v923_v26 = vld [vmem:[#allocation8 + $0x68] sm:$0xff]  ;;  %v83_v27 = vpack.c.bf16 %v919_v24, %v917_v23  ;;  %v929_v29 = vld [vmem:[#allocation8 + $0x70] sm:$0xff]  ;;  %p798_p13 = por %p797_p12, %p796_p11 }
  0x40   :  { %v84_v28 = vpack.c.bf16 %v923_v26, %v921_v25  ;;  %v931_v30 = vld [vmem:[#allocation8 + $0x78] sm:$0xff] }
  0x41   :  { %v85_v31 = vpack.c.bf16 %v931_v30, %v929_v29  ;;  %p799_p0 = pnand %p798_p13, %p792_p10 }
  0x42   :  { %600 = vmatpush3.bf16.msra.mxu0 %v681_v2 }
  0x43   :  { %601 = vmatprep.subr.bf16.mxu0 %v682_v3 }
  0x46   :  { %602 = vmatpush3.bf16.msra.mxu0 %v682_v3 }
  0x47   :  { %603 = vmatprep.subr.bf16.mxu0 %v683_v7 }
  0x4a   :  { %604 = vmatpush3.bf16.msra.mxu0 %v683_v7 }
  0x4b   :  { %605 = vmatprep.subr.bf16.mxu0 %v684_v8 }
  0x4e   :  { %606 = vmatpush3.bf16.msra.mxu0 %v684_v8 }
  0x4f   :  { %607 = vmatprep.subr.bf16.mxu0 %v685_v9 }
  0x52   :  { %608 = vmatpush3.bf16.msra.mxu0 %v685_v9 }
  0x53   :  { %609 = vmatprep.subr.bf16.mxu0 %v686_v10 }
  0x56   :  { %610 = vmatpush3.bf16.msra.mxu0 %v686_v10 }
  0x57   :  { %647 = vmatprep.subr.bf16.mxu0 %v827_v33 }
  0x59   :  { %612 = vmatmul.mubr.bf16.vlgmr.msra.gmra.mrb[0].mxu0 %v79_v15 }
  0x5a   :  { %615 = vmatprep.mubr.bf16.mxu0 %v80_v16 }
  0x61   :  { %616 = vmatmul.mubr.bf16.gmra.mrb[4].mxu0 %v81_v21 }
  0x62   :  { %619 = vmatprep.mubr.bf16.mxu0 %v82_v22 }
  0x69   :  { %620 = vmatmul.mubr.bf16.gmra.mrb[8].mxu0 %v83_v27 }
  0x6a   :  { %623 = vmatprep.mubr.bf16.mxu0 %v84_v28 }
  0x71   :  { %624 = vmatmul.mubr.bf16.gmra.mrb[12].mxu0 %v85_v31 }
  0x72   :  { %663 = vmatprep.mubr.msk.bf16.mxu0 %vm828_vm0, %v827_v33 }
 0x12c   :  { %v613_v34 = vpop.f32.mrb[0].mxu0 }
 0x12d   :  { %v184_v35 = vpop.f32.mrb[1].mxu0  ;;  %v265_v38 = vmul.f32 0.01, %v613_v34  ;;  %vm249_vm1 = vcmp.ge.f32.partialorder %v613_v34, 0.0 }
 0x12e   :  { %v614_v36 = vpop.f32.mrb[2].mxu0  ;;  %v263_v39 = vmul.f32 0.01, %v184_v35  ;;  %vm247_vm2 = vcmp.ge.f32.partialorder %v184_v35, 0.0 }
 0x12f   :  { %v187_v37 = vpop.f32.mrb[3].mxu0  ;;  %vm250_vm3 = vcmp.ge.f32.partialorder %v614_v36, 0.0  ;;  %v939_v41 = vsel %vm249_vm1, %v613_v34, %v265_v38  ;;  %v266_v42 = vmul.f32 0.01, %v614_v36 }
 0x130   :  { %v941_v45 = vsel %vm247_vm2, %v184_v35, %v263_v39  ;;  %v264_v46 = vmul.f32 0.01, %v187_v37  ;;  %vm248_vm6 = vcmp.ge.f32.partialorder %v187_v37, 0.0 }
 0x131   :  { %v950_v55 = vsel %vm250_vm3, %v614_v36, %v266_v42 }
 0x132   :  { %v956_v58 = vsel %vm248_vm6, %v187_v37, %v264_v46 }
 0x134   :  { %v617_v40 = vpop.f32.mrb[4].mxu0 }
 0x135   :  { %vm253_vm4 = vcmp.ge.f32.partialorder %v617_v40, 0.0  ;;  %v269_v43 = vmul.f32 0.01, %v617_v40  ;;  %v200_v44 = vpop.f32.mrb[5].mxu0 }
 0x136   :  { %vm251_vm5 = vcmp.ge.f32.partialorder %v200_v44, 0.0  ;;  %v267_v47 = vmul.f32 0.01, %v200_v44  ;;  %v618_v48 = vpop.f32.mrb[6].mxu0 }
 0x137   :  { %v943_v49 = vsel %vm253_vm4, %v617_v40, %v269_v43  ;;  %vm254_vm7 = vcmp.ge.f32.partialorder %v618_v48, 0.0  ;;  %v270_v50 = vmul.f32 0.01, %v618_v48  ;;  %v203_v51 = vpop.f32.mrb[7].mxu0 }
 0x138   :  { %v298_v52 = vmax.f32 %v939_v41, %v943_v49  ;;  %v947_v53 = vsel %vm251_vm5, %v200_v44, %v267_v47  ;;  %vm252_vm8 = vcmp.ge.f32.partialorder %v203_v51, 0.0  ;;  %v268_v54 = vmul.f32 0.01, %v203_v51 }
 0x139   :  { %v296_v56 = vmax.f32 %v941_v45, %v947_v53  ;;  %v954_v57 = vsel %vm254_vm7, %v618_v48, %v270_v50 }
 0x13a   :  { %v299_v59 = vmax.f32 %v950_v55, %v954_v57  ;;  %v960_v60 = vsel %vm252_vm8, %v203_v51, %v268_v54 }
 0x13b   :  { %v297_v61 = vmax.f32 %v956_v58, %v960_v60 }
 0x13c   :  { %v621_v62 = vpop.f32.mrb[8].mxu0 }
 0x13d   :  { %vm257_vm9 = vcmp.ge.f32.partialorder %v621_v62, 0.0  ;;  %v273_v63 = vmul.f32 0.01, %v621_v62  ;;  %v216_v0 = vpop.f32.mrb[9].mxu0 }
 0x13e   :  { %vm255_vm10 = vcmp.ge.f32.partialorder %v216_v0, 0.0  ;;  %v271_v1 = vmul.f32 0.01, %v216_v0  ;;  %v622_v2 = vpop.f32.mrb[10].mxu0 }
 0x13f   :  { %v964_v3 = vsel %vm257_vm9, %v621_v62, %v273_v63  ;;  %vm258_vm11 = vcmp.ge.f32.partialorder %v622_v2, 0.0  ;;  %v274_v6 = vmul.f32 0.01, %v622_v2  ;;  %v219_v7 = vpop.f32.mrb[11].mxu0 }
 0x140   :  { %v302_v8 = vmax.f32 %v298_v52, %v964_v3  ;;  %v967_v9 = vsel %vm255_vm10, %v216_v0, %v271_v1  ;;  %vm256_vm12 = vcmp.ge.f32.partialorder %v219_v7, 0.0  ;;  %v272_v10 = vmul.f32 0.01, %v219_v7  ;;  %v295_v1 = vld [vmem:[#allocation4] sm:$0x1] }
 0x141   :  { %v300_v15 = vmax.f32 %v296_v56, %v967_v9  ;;  %v970_v16 = vsel %vm258_vm11, %v622_v2, %v274_v6 }
 0x142   :  { %v303_v21 = vmax.f32 %v299_v59, %v970_v16  ;;  %v973_v22 = vsel %vm256_vm12, %v219_v7, %v272_v10  ;;  %v322_v59 = vlaneseq }
 0x143   :  { %v301_v27 = vmax.f32 %v297_v61, %v973_v22 }
 0x144   :  { %v625_v28 = vpop.f32.mrb[12].mxu0  ;;  %v985_v63 = vshrl.u32 %v322_v59, 7 }
 0x145   :  { %vm261_vm13 = vcmp.ge.f32.partialorder %v625_v28, 0.0  ;;  %v277_v31 = vmul.f32 0.01, %v625_v28  ;;  %v232_v32 = vpop.f32.mrb[13].mxu0 }
 0x146   :  { %vm259_vm14 = vcmp.ge.f32.partialorder %v232_v32, 0.0  ;;  %v275_v34 = vmul.f32 0.01, %v232_v32  ;;  %v626_v35 = vpop.f32.mrb[14].mxu0  ;;  %v324_v6 = vsub.s32 0, %v985_v63 }
 0x147   :  { %v976_v36 = vsel %vm261_vm13, %v625_v28, %v277_v31  ;;  %vm262_vm15 = vcmp.ge.f32.partialorder %v626_v35, 0.0  ;;  %v278_v37 = vmul.f32 0.01, %v626_v35  ;;  %v235_v38 = vpop.f32.mrb[15].mxu0 }
 0x148   :  { %v306_v39 = vmax.f32 %v302_v8, %v976_v36  ;;  %v979_v40 = vsel %vm259_vm14, %v232_v32, %v275_v34  ;;  %vm260_vm0 = vcmp.ge.f32.partialorder %v235_v38, 0.0  ;;  %v276_v42 = vmul.f32 0.01, %v235_v38 }
 0x149   :  { %v304_v43 = vmax.f32 %v300_v15, %v979_v40  ;;  %v982_v44 = vsel %vm262_vm15, %v626_v35, %v278_v37 }
 0x14a   :  { %v307_v46 = vmax.f32 %v303_v21, %v982_v44  ;;  %v292_v47 = vsel %vm260_vm0, %v235_v38, %v276_v42 }
 0x14b   :  { %v305_v48 = vmax.f32 %v301_v27, %v292_v47 }
 0x14c   :  { %v309_v50 = vmax.f32 %v306_v39, %v307_v46 }
 0x14d   :  { %v308_v51 = vmax.f32 %v304_v43, %v305_v48 }
 0x14f   :  { %v310_v52 = vmax.f32 %v308_v51, %v309_v50 }
 0x151   :  { %v311_v54 = vrot.slane %v310_v52, 4 }
 0x153   :  { %v312_v56 = vmax.f32 %v310_v52, %v311_v54 }
 0x155   :  { %v313_v61 = vrot.slane %v312_v56, 2 }
 0x157   :  { %v314_v62 = vmax.f32 %v312_v56, %v313_v61 }
 0x159   :  { %v315_v0 = vrot.slane %v314_v62, 1 }
 0x15b   :  { %v316_v2 = vmax.f32 %v314_v62, %v315_v0 }
 0x15d   :  { %v317_v7 = vmax.f32 %v295_v1, %v316_v2 }
 0x15f   :  { %v325_v8 = vrot.slane %v317_v7, %v324_v6  ;;  %515 = vst [vmem:[#allocation4] sm:$0x1] %v317_v7  ;;  %v318_v10 = vsub.f32 %v295_v1, %v317_v7 }
 0x161   :  { %v340_v15 = vsub.f32 %v292_v47, %v325_v8  ;;  %v327_v21 = vsub.f32 %v941_v45, %v325_v8  ;;  %v328_v27 = vsub.f32 %v956_v58, %v325_v8  ;;  %v329_v28 = vsub.f32 %v939_v41, %v325_v8 }
 0x162   :  { %v330_v31 = vsub.f32 %v950_v55, %v325_v8  ;;  %v331_v32 = vsub.f32 %v947_v53, %v325_v8  ;;  %v332_v34 = vsub.f32 %v960_v60, %v325_v8  ;;  %v333_v35 = vsub.f32 %v943_v49, %v325_v8 }
 0x163   :  { %v369_v37 = vmul.f32 1.442695, %v340_v15  ;;  %v343_v38 = vmul.f32 1.442695, %v327_v21  ;;  %v345_v39 = vmul.f32 1.442695, %v328_v27  ;;  %v334_v42 = vsub.f32 %v954_v57, %v325_v8 }
 0x164   :  { %v347_v43 = vmul.f32 1.442695, %v329_v28  ;;  %v335_v45 = vsub.f32 %v967_v9, %v325_v8  ;;  %v349_v58 = vmul.f32 1.442695, %v330_v31  ;;  %v351_v46 = vmul.f32 1.442695, %v331_v32 }
 0x165   :  { %687 = vpow2.f32 %v369_v37  ;;  %v353_v41 = vmul.f32 1.442695, %v332_v34  ;;  %v336_v55 = vsub.f32 %v973_v22, %v325_v8  ;;  %v337_v53 = vsub.f32 %v964_v3, %v325_v8 }
 0x166   :  { %689 = vpow2.f32 %v343_v38  ;;  %v338_v49 = vsub.f32 %v970_v16, %v325_v8  ;;  %v339_v60 = vsub.f32 %v979_v40, %v325_v8  ;;  %v341_v47 = vsub.f32 %v976_v36, %v325_v8 }
 0x167   :  { %691 = vpow2.f32 %v345_v39  ;;  %v355_v57 = vmul.f32 1.442695, %v333_v35  ;;  %v342_v9 = vsub.f32 %v982_v44, %v325_v8  ;;  %v357_v48 = vmul.f32 1.442695, %v334_v42 }
 0x168   :  { %693 = vpow2.f32 %v347_v43  ;;  %v359_v50 = vmul.f32 1.442695, %v335_v45  ;;  %v361_v51 = vmul.f32 1.442695, %v336_v55  ;;  %v363_v22 = vmul.f32 1.442695, %v337_v53 }
 0x169   :  { %695 = vpow2.f32 %v349_v58  ;;  %v365_v3 = vmul.f32 1.442695, %v338_v49  ;;  %v367_v16 = vmul.f32 1.442695, %v339_v60  ;;  %v371_v36 = vmul.f32 1.442695, %v341_v47 }
 0x16a   :  { %697 = vpow2.f32 %v351_v46  ;;  %v373_v54 = vmul.f32 1.442695, %v342_v9  ;;  %v319_v59 = vmul.f32 1.442695, %v318_v10 }
 0x16b   :  { %699 = vpow2.f32 %v353_v41 }
 0x16c   :  { %701 = vpow2.f32 %v355_v57 }
 0x16d   :  { %703 = vpow2.f32 %v357_v48 }
 0x16e   :  { %705 = vpow2.f32 %v359_v50 }
 0x16f   :  { %v1005_v52 = vpop.eup %687  ;;  %707 = vpow2.f32 %v361_v51 }
 0x170   :  { %v690_v40 = vpop.eup %689  ;;  %709 = vpow2.f32 %v363_v22  ;;  %v402_v58 = vmul.f32 %v1005_v52, %v923_v26 }
 0x171   :  { %v692_v44 = vpop.eup %691  ;;  %v389_v56 = vmul.f32 %v690_v40, %v887_v4  ;;  %711 = vpow2.f32 %v365_v3 }
 0x172   :  { %v694_v61 = vpop.eup %693  ;;  %v413_v62 = vpack.c.bf16 %v692_v44, %v690_v40  ;;  %v390_v0 = vmul.f32 %v692_v44, %v889_v5  ;;  %713 = vpow2.f32 %v367_v16 }
 0x173   :  { %v696_v1 = vpop.eup %695  ;;  %v391_v2 = vmul.f32 %v694_v61, %v893_v11  ;;  %715 = vpow2.f32 %v371_v36 }
 0x174   :  { %v698_v7 = vpop.eup %697  ;;  %648 = vmatpush3.bf16.msra.mxu0 %v413_v62  ;;  %v405_v8 = vpack.c.bf16 %v390_v0, %v389_v56  ;;  %v414_v15 = vpack.c.bf16 %v696_v1, %v694_v61  ;;  %v392_v21 = vmul.f32 %v696_v1, %v895_v12  ;;  %717 = vpow2.f32 %v373_v54 }
 0x175   :  { %v700_v27 = vpop.eup %699  ;;  %649 = vmatprep.subr.bf16.mxu0 %v827_v33  ;;  %v393_v4 = vmul.f32 %v698_v7, %v897_v13  ;;  %719 = vpow2.f32 %v319_v59 }
 0x176   :  { %v702_v10 = vpop.eup %701  ;;  %628 = vmatpush3.bf16.msra.mxu1 %v405_v8  ;;  %v406_v5 = vpack.c.bf16 %v392_v21, %v391_v2  ;;  %v415_v28 = vpack.c.bf16 %v700_v27, %v698_v7  ;;  %v394_v11 = vmul.f32 %v700_v27, %v899_v14 }
 0x177   :  { %v704_v31 = vpop.eup %703  ;;  %629 = vmatprep.subr.bf16.mxu1 %v827_v33  ;;  %v395_v32 = vmul.f32 %v702_v10, %v905_v17 }
 0x178   :  { %v706_v34 = vpop.eup %705  ;;  %650 = vmatpush3.bf16.msra.mxu0 %v414_v15  ;;  %v407_v12 = vpack.c.bf16 %v394_v11, %v393_v4  ;;  %v416_v35 = vpack.c.bf16 %v704_v31, %v702_v10  ;;  %v396_v37 = vmul.f32 %v704_v31, %v907_v18 }
 0x179   :  { %v708_v38 = vpop.eup %707  ;;  %651 = vmatprep.subr.bf16.mxu0 %v827_v33  ;;  %v397_v13 = vmul.f32 %v706_v34, %v909_v19 }
 0x17a   :  { %v710_v39 = vpop.eup %709  ;;  %630 = vmatpush3.bf16.msra.mxu1 %v406_v5  ;;  %v408_v42 = vpack.c.bf16 %v396_v37, %v395_v32  ;;  %v417_v14 = vpack.c.bf16 %v708_v38, %v706_v34  ;;  %v398_v43 = vmul.f32 %v708_v38, %v911_v20 }
 0x17b   :  { %v712_v45 = vpop.eup %711  ;;  %631 = vmatprep.subr.bf16.mxu1 %v827_v33  ;;  %v399_v17 = vmul.f32 %v710_v39, %v917_v23 }
 0x17c   :  { %v714_v18 = vpop.eup %713  ;;  %652 = vmatpush3.bf16.msra.mxu0 %v415_v28  ;;  %v409_v46 = vpack.c.bf16 %v398_v43, %v397_v13  ;;  %v418_v41 = vpack.c.bf16 %v712_v45, %v710_v39  ;;  %v400_v19 = vmul.f32 %v712_v45, %v919_v24 }
 0x17d   :  { %v716_v55 = vpop.eup %715  ;;  %653 = vmatprep.subr.bf16.mxu0 %v827_v33  ;;  %v419_v53 = vpack.c.bf16 %v1005_v52, %v714_v18  ;;  %v401_v20 = vmul.f32 %v714_v18, %v921_v25  ;;  %v554_v25 = vld [vmem:[#allocation5] ss:$0 sm:$0xff] }
 0x17e   :  { %v718_v49 = vpop.eup %717  ;;  %632 = vmatpush3.bf16.msra.mxu1 %v407_v12  ;;  %v410_v60 = vpack.c.bf16 %v400_v19, %v399_v17  ;;  %v403_v23 = vmul.f32 %v716_v55, %v929_v29  ;;  %vm385_vm1 = vcmp.eq.s32.totalorder %v985_v63, %v554_v25  ;;  %v829_v29 = vmov 1.0|1.0  }
 0x17f   :  { %v720_v47 = vpop.eup %719  ;;  %633 = vmatprep.subr.bf16.mxu1 %v827_v33  ;;  %v411_v26 = vpack.c.bf16 %v402_v58, %v401_v20  ;;  %v420_v57 = vpack.c.bf16 %v718_v49, %v716_v55  ;;  %v404_v9 = vmul.f32 %v718_v49, %v931_v30  ;;  %vm556_vm2 = vmpackc.low %vm385_vm1, %vm385_vm1 }
 0x180   :  { %654 = vmatpush3.bf16.msra.mxu0 %v416_v35  ;;  %v426_v24 = vrot.slane %v720_v47, %v324_v6 }
 0x181   :  { %655 = vmatprep.subr.bf16.mxu0 %v827_v33  ;;  %v412_v48 = vpack.c.bf16 %v404_v9, %v403_v23 }
 0x182   :  { %634 = vmatpush3.bf16.msra.mxu1 %v408_v42  ;;  %v428_v30 = vmul.f32 0.0, %v426_v24 }
 0x183   :  { %635 = vmatprep.subr.bf16.mxu1 %v827_v33 }
 0x184   :  { %656 = vmatpush3.bf16.msra.mxu0 %v417_v14 }
 0x185   :  { %657 = vmatprep.subr.bf16.mxu0 %v827_v33 }
 0x186   :  { %636 = vmatpush3.bf16.msra.mxu1 %v409_v46 }
 0x187   :  { %637 = vmatprep.subr.bf16.mxu1 %v827_v33 }
 0x188   :  { %658 = vmatpush3.bf16.msra.mxu0 %v418_v41 }
 0x189   :  { %659 = vmatprep.subr.bf16.mxu0 %v827_v33 }
 0x18a   :  { %638 = vmatpush3.bf16.msra.mxu1 %v410_v60 }
 0x18b   :  { %639 = vmatprep.subr.bf16.mxu1 %v827_v33 }
 0x18c   :  { %660 = vmatpush3.bf16.msra.mxu0 %v419_v53 }
 0x18d   :  { %661 = vmatprep.subr.bf16.mxu0 %v827_v33 }
 0x18e   :  { %640 = vmatpush3.bf16.msra.mxu1 %v411_v26 }
 0x18f   :  { %641 = vmatprep.subr.bf16.mxu1 %v827_v33 }
 0x190   :  { %662 = vmatpush3.bf16.msra.mxu0 %v420_v57 }
 0x192   :  { %642 = vmatpush3.bf16.msra.mxu1 %v412_v48 }
 0x193   :  { %664 = vmatmul.mubr.msk.bf16.vlgmr.msra.gmra.mrb[16].mxu0 %vm556_vm2, %v829_v29 }
 0x195   :  { %644 = vmatmul.mubr.msk.bf16.vlgmr.msra.gmra.mrb[0].mxu1 %vm556_vm2, %v829_v29 }
 0x266   :  { %v507_v6 = vpop.f32.mrb[16].mxu0 }
 0x267   :  { %v513_v50 = vadd.f32 %v507_v6, %v428_v30  ;;  %v665_v51 = vpop.f32.mrb[17].mxu0 }
 0x268   :  { %v463_v22 = vpop.f32.mrb[0].mxu1  ;;  %v510_v3 = vpop.f32.mrb[18].mxu0 }
 0x269   :  { %v520_v16 = vmax.f32 %v513_v50, 1e-30  ;;  %v469_v52 = vadd.f32 %v463_v22, %v428_v30  ;;  %v666_v36 = vpop.f32.mrb[19].mxu0  ;;  %v645_v40 = vpop.f32.mrb[1].mxu1 }
 0x26a   :  { %v466_v63 = vpop.f32.mrb[2].mxu1 }
 0x26b   :  { %721 = vrcp.f32 %v520_v16  ;;  %v646_v54 = vpop.f32.mrb[3].mxu1 }
 0x275   :  { %v722_v33 = vpop.eup %721 }
 0x276   :  { %v523_v44 = vmul.f32 %v722_v33, %v469_v52 }
 0x278   :  { %v525_v56 = vmul.f32 1.442695, %v523_v44  ;;  %vm524_vm3 = vcmp.gt.f32.partialorder %v523_v44, 0.0 }
 0x27a   :  { %723 = vpow2.f32 %v525_v56 }
 0x284   :  { %v724_v59 = vpop.eup %723 }
 0x285   :  { %v560_v61 = vadd.f32 -1.0, %v724_v59 }
 0x287   :  { %v528_v62 = vsel %vm524_vm3, %v523_v44, %v560_v61 }
 0x288   :  { %529 = vst [vmem:[#allocation11] sm:$0xff] %v528_v62 }
 0x289   :  { %802 = shalt.err (!%p799_p0)
}
 0x28a   :  { %s803_s28 = scalar_lea.hbm %s1057_s3, 128 }
 0x28b   :  { %p804_p1 = scmp.ne.s32.totalorder %s1057_s3, %s803_s28  ;;  %p807_p2 = scmp.lt.u32.totalorder %s803_s28, %s1057_s3 }
 0x28d   :  { %p809_p3 = pnand %p807_p2, %p804_p1 }
 0x28f   :  { %812 = shalt.err (!%p809_p3)
}
 0x290   :  { %539 = dma.vmem_to_hbm [thread:$0]  %s537_s24, 128, %s1057_s3, [#allocation7]  }
 0x291   :  { %817 = dma.done.wait [#allocation7], 128  }
 0x292   :  { %818 = vsyncadd [#allocation7], 4294967168 }
 0x293   :  { %543 = vsyncpa [#allocation6], 1 }
 0x294   :  { %544 = vsyncpa [#allocation9], 1 }
 0x295   :  { %545 = vsyncpa [#allocation7], 1 }

</bundles_post_ra>
